<compile_context>
chip_gen: v7x
topology: tpu7x:2x2x1
jax: 0.10.0
libtpu: 0.0.40
codegen_flags: <defaults>
</compile_context>

<pallas_src>
import jax
import jax.numpy as jnp
from jax.experimental import pallas as pl
from jax.experimental.pallas import tpu as pltpu

IN_F = 10          # input features (fc1 in)
OUT_F = 10         # output features (out layer)
FEAT_PAD = 16      # padded feature dim for the VMEM-resident weight slabs
MID_PAD = 8        # padded row count for the middle (5, 2, 5) intermediates
NUM_LAYERS = 4


def autoencoder_kernel(x_ref, w_ref, b_ref, o_ref):
    # x_ref: (IN_F, TB)              feature-major batch tile (lane axis = batch)
    # w_ref: (4, FEAT_PAD, FEAT_PAD) zero-padded (out, in) weights, VMEM-resident
    # b_ref: (4, FEAT_PAD, 1)        zero-padded biases, VMEM-resident
    # o_ref: (OUT_F, TB)
    x = x_ref[...]                                              # (10, TB) f32

    # fc1: 10 -> 5 (computed as 8 sublane-aligned rows)
    w0 = w_ref[0][:MID_PAD, :IN_F]                              # (8, 10)
    h = jnp.dot(w0, x, preferred_element_type=jnp.float32)      # (8, TB)
    h = jnp.maximum(h + b_ref[0][:MID_PAD], 0.0)

    # bottle: 5 -> 2
    w1 = w_ref[1][:MID_PAD, :MID_PAD]                           # (8, 8)
    h = jnp.dot(w1, h, preferred_element_type=jnp.float32)      # (8, TB)
    h = jnp.maximum(h + b_ref[1][:MID_PAD], 0.0)

    # fc2: 2 -> 5
    w2 = w_ref[2][:MID_PAD, :MID_PAD]                           # (8, 8)
    h = jnp.dot(w2, h, preferred_element_type=jnp.float32)      # (8, TB)
    h = jnp.maximum(h + b_ref[2][:MID_PAD], 0.0)

    # out: 5 -> 10 (no ReLU); compute 16 aligned rows, store the first 10
    w3 = w_ref[3][:, :MID_PAD]                                  # (16, 8)
    h = jnp.dot(w3, h, preferred_element_type=jnp.float32) + b_ref[3]  # (16, TB)
    o_ref[...] = h[:OUT_F].astype(o_ref.dtype)                  # (10, TB)


def _round_up(n, m):
    return ((n + m - 1) // m) * m


def autoencoder_forward_fm(x_fm, w_pack, b_pack, *, tile_b=16384):
    """Feature-major path: x_fm is (IN_F, B) float32 -> (OUT_F, B) float32."""
    B = x_fm.shape[1]
    B128 = _round_up(max(B, 1), 128)

    # Requested tile, rounded to a multiple of 128 lanes and never bigger than B.
    tb = max(128, (min(int(tile_b), B128) // 128) * 128)
    # Keep the grid at >= 2 steps when B allows it, so dimension_semantics
    # ("parallel",) has something to shard across the two v7x TensorCores.
    if B128 >= 2 * 128:
        tb = min(tb, _round_up((B128 + 1) // 2, 128))
    B_pad = _round_up(B128, tb)

    x_fm = x_fm.astype(jnp.float32)
    if x_fm.shape[1] != B_pad:
        x_fm = jnp.pad(x_fm, ((0, 0), (0, B_pad - B)))

    grid = (B_pad // tb,)
    out = pl.pallas_call(
        autoencoder_kernel,
        out_shape=jax.ShapeDtypeStruct((OUT_F, B_pad), jnp.float32),
        grid=grid,
        in_specs=[
            # Streamed, double-buffered batch tiles of x (10 rows, tb lanes).
            pl.BlockSpec((IN_F, tb), lambda i: (0, i)),
            # Tiny weight/bias slabs: constant index_map -> VMEM-resident.
            pl.BlockSpec((NUM_LAYERS, FEAT_PAD, FEAT_PAD), lambda i: (0, 0, 0)),
            pl.BlockSpec((NUM_LAYERS, FEAT_PAD, 1), lambda i: (0, 0, 0)),
        ],
        out_specs=pl.BlockSpec((OUT_F, tb), lambda i: (0, i)),
        compiler_params=pltpu.CompilerParams(
            dimension_semantics=("parallel",)),
    )(x_fm, w_pack, b_pack)

    return out[:, :B]


def autoencoder_forward(x, w_pack, b_pack, *, tile_b=16384):
    """Batch-major (PyTorch) interface: x (B, 10) float32 -> (B, 10) float32."""
    # TODO(synk): the transpose passes below are wrapper-side layout plumbing
    # (an extra HBM round trip each for large B); feature-major callers should
    # use autoencoder_forward_fm directly and skip them.
    out_fm = autoencoder_forward_fm(
        x.astype(jnp.float32).T, w_pack, b_pack, tile_b=tile_b)
    return out_fm.T


def init_params(key):
    """PyTorch nn.Linear-style params: list of (W:(out,in), b:(out,)) float32."""
    dims = [(10, 5), (5, 2), (2, 5), (5, 10)]   # (in, out) per layer
    params = []
    for fan_in, fan_out in dims:
        key, kw, kb = jax.random.split(key, 3)
        bound = 1.0 / jnp.sqrt(fan_in)          # PyTorch default uniform bound
        w = jax.random.uniform(kw, (fan_out, fan_in), jnp.float32, -bound, bound)
        b = jax.random.uniform(kb, (fan_out,), jnp.float32, -bound, bound)
        params.append((w, b))
    return params


def pack_params(params):
    """Zero-pad every layer to (16,16)/(16,1) and stack -> 2 resident operands."""
    w_pack = jnp.zeros((NUM_LAYERS, FEAT_PAD, FEAT_PAD), jnp.float32)
    b_pack = jnp.zeros((NUM_LAYERS, FEAT_PAD, 1), jnp.float32)
    for l, (w, b) in enumerate(params):
        out_f, in_f = w.shape
        w_pack = w_pack.at[l, :out_f, :in_f].set(w)
        b_pack = b_pack.at[l, :out_f, 0].set(b)
    return w_pack, b_pack


def reference_forward(x, params):
    h = x
    for l, (w, b) in enumerate(params):
        h = h @ w.T + b
        if l < NUM_LAYERS - 1:
            h = jnp.maximum(h, 0.0)
    return h


if __name__ == "__main__":
    key = jax.random.PRNGKey(0)
    key, kx = jax.random.split(key)

    B = 8
    x = jax.random.normal(kx, (B, IN_F), jnp.float32)
    params = init_params(key)
    w_pack, b_pack = pack_params(params)

    out = autoencoder_forward(x, w_pack, b_pack)
    out = jax.block_until_ready(out)

    ref = reference_forward(x, params)
    assert out.shape == (B, OUT_F)
    assert jnp.allclose(out, ref, atol=1e-5, rtol=1e-5), "mismatch vs reference"

    print("KERNEL_OK")
</pallas_src>

<mosaic_0001>
module attributes {stable_mosaic.version = 11 : i64} {
  func.func @autoencoder_kernel(%arg0: i32, %arg1: memref<10x128xf32, #tpu.memory_space<vmem>>, %arg2: memref<4x16x16xf32, #tpu.memory_space<vmem>>, %arg3: memref<4x16x1xf32, #tpu.memory_space<vmem>>, %arg4: memref<10x128xf32, #tpu.memory_space<vmem>>) attributes {dimension_semantics = [#tpu.dimension_semantics<parallel>], iteration_bounds = array<i64: 1>, scalar_prefetch = 0 : i64, scratch_operands = 0 : i64, tpu.core_type = #tpu.core_type<tc>, window_params = [{transform_indices = @transform_0, window_bounds = array<i64: 10, 128>}, {pipeline_mode = #tpu.pipeline_mode<synchronous>, transform_indices = @transform_1, window_bounds = array<i64: 4, 16, 16>}, {pipeline_mode = #tpu.pipeline_mode<synchronous>, transform_indices = @transform_2, window_bounds = array<i64: 4, 16, 1>}, {transform_indices = @transform_3, window_bounds = array<i64: 10, 128>}]} {
    %c0 = arith.constant 0 : index
    %c0_0 = arith.constant 0 : index
    %0 = vector.load %arg1[%c0, %c0_0] : memref<10x128xf32, #tpu.memory_space<vmem>>, vector<10x128xf32>
    %c0_1 = arith.constant 0 : index
    %c0_2 = arith.constant 0 : index
    %c0_3 = arith.constant 0 : index
    %1 = vector.load %arg2[%c0_1, %c0_2, %c0_3] : memref<4x16x16xf32, #tpu.memory_space<vmem>>, vector<1x16x16xf32>
    %2 = vector.shape_cast %1 : vector<1x16x16xf32> to vector<16x16xf32>
    %3 = vector.extract_strided_slice %2 {offsets = [0, 0], sizes = [8, 10], strides = [1, 1]} : vector<16x16xf32> to vector<8x10xf32>
    %cst = arith.constant dense<0.000000e+00> : vector<8x128xf32>
    %4 = tpu.matmul %3, %0, %cst {dimension_numbers = #tpu.dot_dimension_numbers<[1], [0], [0], [1], [0, 0, 1, 1], [], []>} : vector<8x10xf32>, vector<10x128xf32>, vector<8x128xf32> -> vector<8x128xf32>
    %c0_4 = arith.constant 0 : index
    %c0_5 = arith.constant 0 : index
    %c0_6 = arith.constant 0 : index
    %5 = vector.load %arg3[%c0_4, %c0_5, %c0_6] : memref<4x16x1xf32, #tpu.memory_space<vmem>>, vector<1x16x1xf32>
    %6 = vector.shape_cast %5 : vector<1x16x1xf32> to vector<16x1xf32>
    %7 = vector.extract_strided_slice %6 {offsets = [0, 0], sizes = [8, 1], strides = [1, 1]} : vector<16x1xf32> to vector<8x1xf32>
    %8 = vector.broadcast %7 : vector<8x1xf32> to vector<8x128xf32>
    %9 = arith.addf %4, %8 : vector<8x128xf32>
    %cst_7 = arith.constant 0.000000e+00 : f32
    %10 = vector.broadcast %cst_7 : f32 to vector<8x128xf32>
    %11 = arith.maximumf %9, %10 : vector<8x128xf32>
    %c1 = arith.constant 1 : index
    %c0_8 = arith.constant 0 : index
    %c0_9 = arith.constant 0 : index
    %12 = vector.load %arg2[%c1, %c0_8, %c0_9] : memref<4x16x16xf32, #tpu.memory_space<vmem>>, vector<1x16x16xf32>
    %13 = vector.shape_cast %12 : vector<1x16x16xf32> to vector<16x16xf32>
    %14 = vector.extract_strided_slice %13 {offsets = [0, 0], sizes = [8, 8], strides = [1, 1]} : vector<16x16xf32> to vector<8x8xf32>
    %cst_10 = arith.constant dense<0.000000e+00> : vector<8x128xf32>
    %15 = tpu.matmul %14, %11, %cst_10 {dimension_numbers = #tpu.dot_dimension_numbers<[1], [0], [0], [1], [0, 0, 1, 1], [], []>} : vector<8x8xf32>, vector<8x128xf32>, vector<8x128xf32> -> vector<8x128xf32>
    %c1_11 = arith.constant 1 : index
    %c0_12 = arith.constant 0 : index
    %c0_13 = arith.constant 0 : index
    %16 = vector.load %arg3[%c1_11, %c0_12, %c0_13] : memref<4x16x1xf32, #tpu.memory_space<vmem>>, vector<1x16x1xf32>
    %17 = vector.shape_cast %16 : vector<1x16x1xf32> to vector<16x1xf32>
    %18 = vector.extract_strided_slice %17 {offsets = [0, 0], sizes = [8, 1], strides = [1, 1]} : vector<16x1xf32> to vector<8x1xf32>
    %19 = vector.broadcast %18 : vector<8x1xf32> to vector<8x128xf32>
    %20 = arith.addf %15, %19 : vector<8x128xf32>
    %cst_14 = arith.constant 0.000000e+00 : f32
    %21 = vector.broadcast %cst_14 : f32 to vector<8x128xf32>
    %22 = arith.maximumf %20, %21 : vector<8x128xf32>
    %c2 = arith.constant 2 : index
    %c0_15 = arith.constant 0 : index
    %c0_16 = arith.constant 0 : index
    %23 = vector.load %arg2[%c2, %c0_15, %c0_16] : memref<4x16x16xf32, #tpu.memory_space<vmem>>, vector<1x16x16xf32>
    %24 = vector.shape_cast %23 : vector<1x16x16xf32> to vector<16x16xf32>
    %25 = vector.extract_strided_slice %24 {offsets = [0, 0], sizes = [8, 8], strides = [1, 1]} : vector<16x16xf32> to vector<8x8xf32>
    %cst_17 = arith.constant dense<0.000000e+00> : vector<8x128xf32>
    %26 = tpu.matmul %25, %22, %cst_17 {dimension_numbers = #tpu.dot_dimension_numbers<[1], [0], [0], [1], [0, 0, 1, 1], [], []>} : vector<8x8xf32>, vector<8x128xf32>, vector<8x128xf32> -> vector<8x128xf32>
    %c2_18 = arith.constant 2 : index
    %c0_19 = arith.constant 0 : index
    %c0_20 = arith.constant 0 : index
    %27 = vector.load %arg3[%c2_18, %c0_19, %c0_20] : memref<4x16x1xf32, #tpu.memory_space<vmem>>, vector<1x16x1xf32>
    %28 = vector.shape_cast %27 : vector<1x16x1xf32> to vector<16x1xf32>
    %29 = vector.extract_strided_slice %28 {offsets = [0, 0], sizes = [8, 1], strides = [1, 1]} : vector<16x1xf32> to vector<8x1xf32>
    %30 = vector.broadcast %29 : vector<8x1xf32> to vector<8x128xf32>
    %31 = arith.addf %26, %30 : vector<8x128xf32>
    %cst_21 = arith.constant 0.000000e+00 : f32
    %32 = vector.broadcast %cst_21 : f32 to vector<8x128xf32>
    %33 = arith.maximumf %31, %32 : vector<8x128xf32>
    %c3 = arith.constant 3 : index
    %c0_22 = arith.constant 0 : index
    %c0_23 = arith.constant 0 : index
    %34 = vector.load %arg2[%c3, %c0_22, %c0_23] : memref<4x16x16xf32, #tpu.memory_space<vmem>>, vector<1x16x16xf32>
    %35 = vector.shape_cast %34 : vector<1x16x16xf32> to vector<16x16xf32>
    %36 = vector.extract_strided_slice %35 {offsets = [0, 0], sizes = [16, 8], strides = [1, 1]} : vector<16x16xf32> to vector<16x8xf32>
    %cst_24 = arith.constant dense<0.000000e+00> : vector<16x128xf32>
    %37 = tpu.matmul %36, %33, %cst_24 {dimension_numbers = #tpu.dot_dimension_numbers<[1], [0], [0], [1], [0, 0, 1, 1], [], []>} : vector<16x8xf32>, vector<8x128xf32>, vector<16x128xf32> -> vector<16x128xf32>
    %c3_25 = arith.constant 3 : index
    %c0_26 = arith.constant 0 : index
    %c0_27 = arith.constant 0 : index
    %38 = vector.load %arg3[%c3_25, %c0_26, %c0_27] : memref<4x16x1xf32, #tpu.memory_space<vmem>>, vector<1x16x1xf32>
    %39 = vector.shape_cast %38 : vector<1x16x1xf32> to vector<16x1xf32>
    %40 = vector.broadcast %39 : vector<16x1xf32> to vector<16x128xf32>
    %41 = arith.addf %37, %40 : vector<16x128xf32>
    %42 = vector.extract_strided_slice %41 {offsets = [0, 0], sizes = [10, 128], strides = [1, 1]} : vector<16x128xf32> to vector<10x128xf32>
    %c0_28 = arith.constant 0 : index
    %c0_29 = arith.constant 0 : index
    %43 = vector.load %arg4[%c0_28, %c0_29] : memref<10x128xf32, #tpu.memory_space<vmem>>, vector<10x128xf32>
    tpu.vector_store %arg4[%c0_28, %c0_29], %42 {strides = array<i32>} : memref<10x128xf32, #tpu.memory_space<vmem>>, vector<10x128xf32>,
    return
  }
  func.func @transform_0(%arg0: i32) -> (i32, i32) {
    %c0_i32 = arith.constant 0 : i32
    %c0_i32_0 = arith.constant 0 : i32
    return %c0_i32, %arg0 : i32, i32
  }
  func.func @transform_1(%arg0: i32) -> (i32, i32, i32) {
    %c0_i32 = arith.constant 0 : i32
    %c0_i32_0 = arith.constant 0 : i32
    %c0_i32_1 = arith.constant 0 : i32
    %c0_i32_2 = arith.constant 0 : i32
    return %c0_i32, %c0_i32_0, %c0_i32_1 : i32, i32, i32
  }
  func.func @transform_2(%arg0: i32) -> (i32, i32, i32) {
    %c0_i32 = arith.constant 0 : i32
    %c0_i32_0 = arith.constant 0 : i32
    %c0_i32_1 = arith.constant 0 : i32
    %c0_i32_2 = arith.constant 0 : i32
    return %c0_i32, %c0_i32_0, %c0_i32_1 : i32, i32, i32
  }
  func.func @transform_3(%arg0: i32) -> (i32, i32) {
    %c0_i32 = arith.constant 0 : i32
    %c0_i32_0 = arith.constant 0 : i32
    return %c0_i32, %arg0 : i32, i32
  }
}

</mosaic_0001>

<bundles_post_ra>
// kernel: tpu_custom_call.1
= control target key start
LH: loop header
LB: loop body
LE: loop exit
PB: predicated region body
PF: predicated region fallthrough
CT: control target
= control target key end

     0   :  { %8 = vsyncpa [#allocation3], 0  ;;  %s605_s0 = inlined_call_operand.hbm [shape: f32[10,128], index: 0, kind: input, shape index: {}]   ;;  %s606_s1 = inlined_call_operand.vmem [shape: f32[4,16,16], index: 1, kind: input, shape index: {}]   ;;  %s607_s2 = inlined_call_operand.vmem [shape: f32[4,16,1], index: 2, kind: input, shape index: {}]   ;;  %s608_s3 = inlined_call_operand.hbm [shape: f32[10,128], index: 3, kind: output, shape index: {}]  }
   0x1   :  { %9 = vsyncpa [#allocation4], 0  ;;  %s509_s12 = smov [#allocation2]   ;;  %s461_s16 = scalar_lea.hbm %s605_s0, 256 }
   0x2   :  { %s15_s13 = sshll.u32 %s509_s12, 4  ;;  %p462_p0 = scmp.ne.s32.totalorder %s605_s0, %s461_s16  ;;  %s16_s13 = int_to_ptr.vmem [resolvable:$true] %s15_s13 }
   0x3   :  { %p465_p1 = scmp.lt.u32.totalorder %s461_s16, %s605_s0 }
   0x5   :  { %p467_p2 = pnand %p465_p1, %p462_p0 }
   0x7   :  { %470 = shalt.err (!%p467_p2)
}
   0x8   :  { %s471_s21 = scalar_lea.vmem %s16_s13, 256  ;;  %p476_p4 = scmp.lt.s32.totalorder %s16_s13, %s16_s13 }
   0x9   :  { %p472_p3 = scmp.ne.s32.totalorder %s16_s13, %s471_s21  ;;  %p477_p5 = scmp.lt.s32.totalorder %s471_s21, %s471_s21 }
   0xb   :  { %p478_p6 = por %p477_p5, %p476_p4 }
   0xd   :  { %p479_p7 = pnand %p478_p6, %p472_p3 }
   0xf   :  { %482 = shalt.err (!%p479_p7)
}
  0x10   :  { %s510_s22 = smov 128   ;;  %s511_s23 = smov 8  }
  0x11   :  { %21 = dma.hbm_to_vmem [thread:$0]  %s605_s0, 256, %s16_s13, [#allocation3], %s510_s22, %s510_s22, %s511_s23  }
  0x12   :  { %505 = dma.done.wait [#allocation3], 256  }
  0x13   :  { %506 = vsyncadd [#allocation3], 4294967040  ;;  %v512_v0 = vmov 0.0|0.0   ;;  %vm513_vm0 = vmmov 0   ;;  %v514_v1 = vmov 0.0   ;;  %v515_v2 = vmov 0  }
  0x14   :  { %446 = vmatprep.subr.bf16.mxu0 %v512_v0  ;;  %428 = vmatprep.mubr.msk.f32.mxu0 %vm513_vm0, %v514_v1  ;;  %vm42_vm1 = vcmask 1041408   ;;  %v29_v3 = vld [vmem:[#allocation2] sm:$0xff]  ;;  %v30_v4 = vld [vmem:[#allocation2 + $0x8] sm:$0x3]  ;;  %vm516_vm2 = vmmov 1   ;;  %vm38_vm4 = vcmask 80896  }
  0x15   :  { %459 = vset.pattern.permute.xlu0 %v515_v2  ;;  %431 = vmatprep.subr.mxu1 %v514_v1  ;;  %vm448_vm3 = vmpackc.low %vm42_vm1, %vm516_vm2  ;;  %v447_v5 = vpack.c.bf16 %v30_v4, %v29_v3  ;;  %v32_v6 = vld [vmem:[%s607_s2] sm:$0xff]  ;;  %v403_v8 = vld [vmem:[%s607_s2 + $0x10] sm:$0xff]  ;;  %vm126_vm5 = vcmask 64512   ;;  %s517_s17 = smov [#allocation5]  }
  0x16   :  { %433 = vmatprep.mubr.msk.f32.mxu1 %vm513_vm0, %v514_v1  ;;  %460 = vset.pattern.permute.xlu1 %v515_v2  ;;  %v31_v7 = vld [vmem:[%s606_s1] sm:$0xff]  ;;  %v411_v9 = vld [vmem:[%s607_s2 + $0x38] sm:$0xff]  ;;  %v402_v15 = vld [vmem:[%s606_s1 + $0x10] sm:$0xff]  ;;  %s388_s18 = sshll.u32 %s517_s17, 4  ;;  %s389_s18 = int_to_ptr.vmem [resolvable:$true] %s388_s18 }
  0x17   :  { %35 = vperm.xlu0 %459, %v32_v6   ;;  %449 = vmatpush3.bf16.msk.msra.mxu0 %vm448_vm3, %v447_v5  ;;  %v406_v16 = vld [vmem:[%s607_s2 + $0x20] sm:$0xff]  ;;  %v410_v17 = vld [vmem:[%s607_s2 + $0x30] sm:$0xff]  ;;  %v409_v30 = vld [vmem:[%s606_s1 + $0x38] sm:$0xff]  ;;  %s483_s19 = scalar_lea.vmem %s389_s18, 256  ;;  %p488_p9 = scmp.lt.s32.totalorder %s389_s18, %s389_s18 }
  0x18   :  { %207 = vperm.xlu1 %460, %v406_v16   ;;  %v405_v23 = vld [vmem:[%s606_s1 + $0x20] sm:$0xff]  ;;  %v408_v24 = vld [vmem:[%s606_s1 + $0x30] sm:$0xff]  ;;  %p484_p8 = scmp.ne.s32.totalorder %s389_s18, %s483_s19  ;;  %p489_p10 = scmp.lt.s32.totalorder %s483_s19, %s483_s19 }
  0x1a   :  { %429 = vmatmul.mubr.msk.f32.vlgmr.msra.gmra.mrb[0].mxu0 %vm38_vm4, %v31_v7  ;;  %p490_p11 = por %p489_p10, %p488_p9 }
  0x1b   :  { %123 = vperm.xlu0 %459, %v403_v8   ;;  %443 = vmatprep.mubr.msk.f32.mxu0 %vm126_vm5, %v408_v24 }
  0x1c   :  { %292 = vperm.xlu1 %460, %v410_v17   ;;  %p491_p12 = pnand %p490_p11, %p484_p8 }
  0x1f   :  { %297 = vperm.xlu0 %459, %v411_v9  }
  0x96   :  { %v36_v10 = vpop.permute.xlu0 %35 }
  0x97   :  { %v208_v25 = vpop.permute.xlu1 %207 }
  0x9a   :  { %v124_v18 = vpop.permute.xlu0 %123 }
  0x9b   :  { %v293_v33 = vpop.permute.xlu1 %292 }
  0x9e   :  { %v298_v31 = vpop.permute.xlu0 %297 }
  0xed   :  { %v112_v11 = vpop.f32.mrb[0].mxu0 }
  0xee   :  { %v113_v12 = vadd.f32 %v112_v11, %v36_v10  ;;  %v430_v13 = vpop.f32.mrb[1].mxu0 }
  0xf0   :  { %v116_v14 = vmax.f32 %v113_v12, 0.0 }
  0xf2   :  { %432 = vmatpush3.msra.mxu1 %v116_v14 }
  0xf3   :  { %434 = vmatmul.mubr.msk.f32.vlgmr.msra.gmra.mrb[0].mxu1 %vm126_vm5, %v402_v15  ;;  %436 = vmatprep.subr.mxu1 %v514_v1 }
  0xf4   :  { %438 = vmatprep.mubr.msk.f32.mxu1 %vm513_vm0, %v514_v1 }
 0x1c6   :  { %v196_v19 = vpop.f32.mrb[0].mxu1 }
 0x1c7   :  { %v197_v20 = vadd.f32 %v196_v19, %v124_v18  ;;  %v435_v21 = vpop.f32.mrb[1].mxu1 }
 0x1c9   :  { %v200_v22 = vmax.f32 %v197_v20, 0.0 }
 0x1cb   :  { %437 = vmatpush3.msra.mxu1 %v200_v22 }
 0x1cc   :  { %439 = vmatmul.mubr.msk.f32.vlgmr.msra.gmra.mrb[2].mxu1 %vm126_vm5, %v405_v23 }
 0x29f   :  { %v279_v26 = vpop.f32.mrb[2].mxu1 }
 0x2a0   :  { %v280_v27 = vadd.f32 %v279_v26, %v208_v25  ;;  %v440_v28 = vpop.f32.mrb[3].mxu1 }
 0x2a2   :  { %v283_v29 = vmax.f32 %v280_v27, 0.0 }
 0x2a4   :  { %441 = vmatprep.subr.mxu0 %v283_v29 }
 0x2a5   :  { %442 = vmatpush3.msra.mxu0 %v283_v29 }
 0x2a6   :  { %444 = vmatmul.mubr.msk.f32.vlgmr.msra.gmra.mrb[2].mxu0 %vm126_vm5, %v409_v30 }
 0x379   :  { %v445_v32 = vpop.f32.mrb[2].mxu0 }
 0x37a   :  { %v378_v34 = vadd.f32 %v445_v32, %v298_v31  ;;  %v372_v35 = vpop.f32.mrb[3].mxu0 }
 0x37b   :  { %v373_v36 = vadd.f32 %v372_v35, %v293_v33 }
 0x37c   :  { %382 = vst [vmem:[#allocation5 + $0x8] sm:$0x3] %v378_v34 }
 0x37d   :  { %381 = vst [vmem:[#allocation5] sm:$0xff] %v373_v36 }
 0x37e   :  { %494 = shalt.err (!%p491_p12)
}
 0x37f   :  { %s495_s21 = scalar_lea.hbm %s608_s3, 256 }
 0x380   :  { %p496_p13 = scmp.ne.s32.totalorder %s608_s3, %s495_s21  ;;  %p499_p0 = scmp.lt.u32.totalorder %s495_s21, %s608_s3 }
 0x382   :  { %p501_p1 = pnand %p499_p0, %p496_p13 }
 0x384   :  { %504 = shalt.err (!%p501_p1)
}
 0x385   :  { %394 = dma.vmem_to_hbm [thread:$0]  %s389_s18, 256, %s608_s3, [#allocation4], %s510_s22, %s510_s22, %s511_s23  }
 0x386   :  { %507 = dma.done.wait [#allocation4], 256  }
 0x387   :  { %508 = vsyncadd [#allocation4], 4294967040 }
 0x388   :  { %398 = vsyncpa [#allocation3], 1 }
 0x389   :  { %399 = vsyncpa [#allocation4], 1 }

</bundles_post_ra>
